<compile_context>
chip_gen: v6e
topology: v6e:2x2x1
jax: 0.10.0
libtpu: 0.0.40
codegen_flags: <defaults>
</compile_context>

<pallas_src>
import jax
import jax.numpy as jnp
from jax import lax
from jax.experimental import pallas as pl
from jax.experimental.pallas import tpu as pltpu

HIDDEN = 16        # rn1 (LSTM hidden size)
OUT1 = 16          # fc1 output size
NUM_FEATURES = 32  # min_model feature size
BN_EPS = 1e-5

# Packed-parameter buffer layout (rows x 64 cols, f32):
ROW_WIH = 0                                  # rows [0,32)   : W_ih^T (32, 64)
ROW_WHH = NUM_FEATURES                       # rows [32,48)  : W_hh^T (16, 64)
ROW_B = NUM_FEATURES + HIDDEN                # row 48        : b_ih + b_hh (1, 64)
ROW_FC1 = ROW_B + 1                          # rows [49,65)  : cols [0,16) fc1_w^T, col 16 fc2_w^T
ROW_MISC = ROW_FC1 + OUT1                    # row 65        : fc1_b | bn_g | bn_b | fc2_b
PARAM_ROWS = ROW_MISC + 1                    # 66


def long_head_kernel(x_ref, state_ref, p_ref, out_ref, xg_ref):
    H = HIDDEN
    O = OUT1
    F = NUM_FEATURES
    TB = x_ref.shape[0]          # B*T (batch-major rows: b*T + t)
    B = state_ref.shape[0]
    T = TB // B

    # --- static slices of the single packed parameter buffer -------------
    w_ih = p_ref[ROW_WIH:ROW_WIH + F, :]          # (32, 4H), g-cols pre-scaled x2
    w_hh = p_ref[ROW_WHH:ROW_WHH + H, :]          # (16, 4H), g-cols pre-scaled x2
    b = p_ref[ROW_B:ROW_B + 1, :]                 # (1, 4H),  g-cols pre-scaled x2

    # --- hoisted input projection for ALL timesteps (one MXU call) -------
    xg_ref[...] = (jnp.dot(x_ref[...], w_ih,
                           preferred_element_type=jnp.float32) + b)   # (B*T, 4H)

    h = state_ref[:, 0:H]                          # (B, H)
    c = state_ref[:, H:2 * H]                      # (B, H)

    # --- LSTM recurrence: static unroll, h/c live in vregs ---------------
    hs_parts = []
    for t in range(T):
        # rows {b*T + t : b in [0,B)} of the batch-major projection
        xg_t = xg_ref[pl.ds(t, B, stride=T), :]                       # (B, 4H)
        gates = xg_t + jnp.dot(h, w_hh, preferred_element_type=jnp.float32)
        s = jax.nn.sigmoid(gates)                  # single full-slab EUP pass
        i = s[:, 0:H]
        f = s[:, H:2 * H]
        g = 2.0 * s[:, 2 * H:3 * H] - 1.0          # tanh via pre-scaled sigmoid
        o = s[:, 3 * H:4 * H]
        c = f * c + i * g
        h = o * jnp.tanh(c)
        hs_parts.append(h)

    hs = jnp.concatenate(hs_parts, axis=0)         # (T*B, H), time-major

    fc1_w = p_ref[ROW_FC1:ROW_FC1 + H, 0:O]        # (16, 16)
    fc2_w = p_ref[ROW_FC1:ROW_FC1 + O, O:O + 1]    # (16, 1)
    misc = p_ref[ROW_MISC:ROW_MISC + 1, :]         # (1, 4H)
    fc1_b = misc[:, 0:O]
    bn_g = misc[:, O:2 * O]
    bn_b = misc[:, 2 * O:3 * O]
    fc2_b = misc[:, 3 * O:3 * O + 1]               # (1, 1)

    # fc1 + relu on all rows (BN statistics need all T*B samples)
    y = jnp.maximum(
        jnp.dot(hs, fc1_w, preferred_element_type=jnp.float32) + fc1_b, 0.0)

    # One-pass training-mode (biased) BatchNorm statistics over T*B rows.
    inv_n = 1.0 / TB
    s1 = jnp.sum(y, axis=0, keepdims=True)
    s2 = jnp.sum(y * y, axis=0, keepdims=True)
    mean = s1 * inv_n
    var = s2 * inv_n - mean * mean

    # Only the last timestep's rows survive the final slice; normalize those.
    y_last = (y[(T - 1) * B:, :] - mean) * (lax.rsqrt(var + BN_EPS) * bn_g) + bn_b
    z = jnp.dot(y_last, fc2_w, preferred_element_type=jnp.float32) + fc2_b
    out_ref[...] = jax.nn.sigmoid(z)


def long_forward(x_btf, h0, c0, packed_params):
    """x_btf: (B, T, 32) min_model features; h0, c0: (B, 16). Returns (B, 1)."""
    B, T, F = x_btf.shape
    # Contiguous reshape only (metadata-level bitcast) — NO host transpose.
    x2d = x_btf.reshape(B * T, F)
    state = jnp.concatenate([h0, c0], axis=1)      # (B, 2H), one tiny concat

    vmem = pl.BlockSpec(memory_space=pltpu.MemorySpace.VMEM)
    flops = (2 * B * T * F * 4 * HIDDEN            # input projection
             + T * 2 * B * HIDDEN * 4 * HIDDEN     # recurrence matmuls
             + 2 * B * T * HIDDEN * OUT1           # fc1
             + 2 * B * OUT1)                       # fc2
    transcendentals = T * B * (4 * HIDDEN + HIDDEN) + B
    bytes_accessed = 4 * (B * T * F + PARAM_ROWS * 4 * HIDDEN
                          + B * 2 * HIDDEN + B)

    return pl.pallas_call(
        long_head_kernel,
        out_shape=jax.ShapeDtypeStruct((B, 1), jnp.float32),
        in_specs=[vmem, vmem, vmem],
        out_specs=vmem,
        scratch_shapes=[pltpu.VMEM((B * T, 4 * HIDDEN), jnp.float32)],  # xg
        cost_estimate=pl.CostEstimate(flops=flops,
                                      transcendentals=transcendentals,
                                      bytes_accessed=bytes_accessed),
    )(x2d, state, packed_params)


def init_params(key):
    ks = jax.random.split(key, 8)
    k_lstm = 1.0 / jnp.sqrt(HIDDEN)
    w_ih = jax.random.uniform(ks[0], (4 * HIDDEN, NUM_FEATURES), jnp.float32, -k_lstm, k_lstm)
    w_hh = jax.random.uniform(ks[1], (4 * HIDDEN, HIDDEN), jnp.float32, -k_lstm, k_lstm)
    b_ih = jax.random.uniform(ks[2], (4 * HIDDEN,), jnp.float32, -k_lstm, k_lstm)
    b_hh = jax.random.uniform(ks[3], (4 * HIDDEN,), jnp.float32, -k_lstm, k_lstm)
    k_fc1 = 1.0 / jnp.sqrt(HIDDEN)
    fc1_w = jax.random.uniform(ks[4], (OUT1, HIDDEN), jnp.float32, -k_fc1, k_fc1)
    fc1_b = jax.random.uniform(ks[5], (OUT1,), jnp.float32, -k_fc1, k_fc1)
    k_fc2 = 1.0 / jnp.sqrt(OUT1)
    fc2_w = jax.random.uniform(ks[6], (1, OUT1), jnp.float32, -k_fc2, k_fc2)
    fc2_b = jax.random.uniform(ks[7], (1,), jnp.float32, -k_fc2, k_fc2)
    return dict(
        w_ih_t=jnp.asarray(w_ih.T),                       # (32, 64)
        w_hh_t=jnp.asarray(w_hh.T),                       # (16, 64)
        b=(b_ih + b_hh).reshape(1, 4 * HIDDEN),           # (1, 64)
        fc1_w_t=jnp.asarray(fc1_w.T),                     # (16, 16)
        fc1_b=fc1_b.reshape(1, OUT1),
        bn_g=jnp.ones((1, OUT1), jnp.float32),
        bn_b=jnp.zeros((1, OUT1), jnp.float32),
        fc2_w_t=jnp.asarray(fc2_w.T),                     # (16, 1)
        fc2_b=fc2_b.reshape(1, 1),
    )


def pack_params(p):
    """Pack all head params into one (66, 64) f32 buffer; pre-scale the
    g-gate columns [2H:3H] of W_ih^T, W_hh^T and b by 2 so the kernel can use
    tanh(x) = 2*sigmoid(2x) - 1 with a single full-slab sigmoid per step."""
    H, F, O = HIDDEN, NUM_FEATURES, OUT1
    gcols = slice(2 * H, 3 * H)
    w_ih_t = p['w_ih_t'].at[:, gcols].multiply(2.0)
    w_hh_t = p['w_hh_t'].at[:, gcols].multiply(2.0)
    b = p['b'].at[:, gcols].multiply(2.0)

    buf = jnp.zeros((PARAM_ROWS, 4 * H), jnp.float32)
    buf = buf.at[ROW_WIH:ROW_WIH + F, :].set(w_ih_t)
    buf = buf.at[ROW_WHH:ROW_WHH + H, :].set(w_hh_t)
    buf = buf.at[ROW_B:ROW_B + 1, :].set(b)
    buf = buf.at[ROW_FC1:ROW_FC1 + H, 0:O].set(p['fc1_w_t'])
    buf = buf.at[ROW_FC1:ROW_FC1 + O, O:O + 1].set(p['fc2_w_t'])
    buf = buf.at[ROW_MISC, 0:O].set(p['fc1_b'][0])
    buf = buf.at[ROW_MISC, O:2 * O].set(p['bn_g'][0])
    buf = buf.at[ROW_MISC, 2 * O:3 * O].set(p['bn_b'][0])
    buf = buf.at[ROW_MISC, 3 * O].set(p['fc2_b'][0, 0])
    return buf


def reference(x_btf, h0, c0, p):
    """Pure-JAX reference (unscaled params, two-pass BN) for correctness."""
    B, T, F = x_btf.shape

    def step(carry, x_t):
        h, c = carry
        g = x_t @ p['w_ih_t'] + h @ p['w_hh_t'] + p['b']
        i = jax.nn.sigmoid(g[:, :HIDDEN])
        f = jax.nn.sigmoid(g[:, HIDDEN:2 * HIDDEN])
        gg = jnp.tanh(g[:, 2 * HIDDEN:3 * HIDDEN])
        o = jax.nn.sigmoid(g[:, 3 * HIDDEN:])
        c = f * c + i * gg
        h = o * jnp.tanh(c)
        return (h, c), h

    _, hs = lax.scan(step, (h0, c0), jnp.transpose(x_btf, (1, 0, 2)))
    hs = hs.reshape(T * B, HIDDEN)
    y = jnp.maximum(hs @ p['fc1_w_t'] + p['fc1_b'], 0.0)
    mean = y.mean(0, keepdims=True)
    var = ((y - mean) ** 2).mean(0, keepdims=True)
    y = (y - mean) / jnp.sqrt(var + BN_EPS) * p['bn_g'] + p['bn_b']
    z = jax.nn.sigmoid(y @ p['fc2_w_t'] + p['fc2_b'])
    return z[(T - 1) * B:, :]


if __name__ == "__main__":
    key = jax.random.PRNGKey(0)
    k_param, k_x, k_h, k_c = jax.random.split(key, 4)

    B = 2
    DAYS_BACK = 7
    T = DAYS_BACK + 1           # sequence_length = daysBack + 1

    params = init_params(k_param)
    packed = pack_params(params)
    x_feat = jax.random.normal(k_x, (B, T, NUM_FEATURES), jnp.float32)  # min_model output
    h0 = jax.random.normal(k_h, (B, HIDDEN), jnp.float32)               # torch.randn(1,B,16) squeezed
    c0 = jax.random.normal(k_c, (B, HIDDEN), jnp.float32)

    out = jax.block_until_ready(long_forward(x_feat, h0, c0, packed))
    ref = jax.block_until_ready(reference(x_feat, h0, c0, params))

    assert out.shape == (B, 1), out.shape
    assert jnp.allclose(out, ref, rtol=1e-3, atol=1e-3), (out, ref)
    print("KERNEL_OK")
</pallas_src>

<mosaic_0001>
module attributes {stable_mosaic.version = 11 : i64} {
  func.func @long_head_kernel(%arg0: memref<16x32xf32, #tpu.memory_space<vmem>>, %arg1: memref<2x32xf32, #tpu.memory_space<vmem>>, %arg2: memref<66x64xf32, #tpu.memory_space<vmem>>, %arg3: memref<2x1xf32, #tpu.memory_space<vmem>>, %arg4: memref<16x64xf32, #tpu.memory_space<vmem>>) attributes {dimension_semantics = [], scalar_prefetch = 0 : i64, scratch_operands = 1 : i64, tpu.core_type = #tpu.core_type<tc>} {
    %c0 = arith.constant 0 : index
    %c0_0 = arith.constant 0 : index
    %0 = vector.load %arg2[%c0, %c0_0] : memref<66x64xf32, #tpu.memory_space<vmem>>, vector<32x64xf32>
    %c32 = arith.constant 32 : index
    %c0_1 = arith.constant 0 : index
    %1 = vector.load %arg2[%c32, %c0_1] : memref<66x64xf32, #tpu.memory_space<vmem>>, vector<16x64xf32>
    %c48 = arith.constant 48 : index
    %c0_2 = arith.constant 0 : index
    %2 = vector.load %arg2[%c48, %c0_2] : memref<66x64xf32, #tpu.memory_space<vmem>>, vector<1x64xf32>
    %c0_3 = arith.constant 0 : index
    %c0_4 = arith.constant 0 : index
    %3 = vector.load %arg0[%c0_3, %c0_4] : memref<16x32xf32, #tpu.memory_space<vmem>>, vector<16x32xf32>
    %cst = arith.constant dense<0.000000e+00> : vector<16x64xf32>
    %4 = tpu.matmul %3, %0, %cst {dimension_numbers = #tpu.dot_dimension_numbers<[1], [0], [0], [1], [0, 0, 1, 1], [], []>} : vector<16x32xf32>, vector<32x64xf32>, vector<16x64xf32> -> vector<16x64xf32>
    %5 = vector.broadcast %2 : vector<1x64xf32> to vector<16x64xf32>
    %6 = arith.addf %4, %5 : vector<16x64xf32>
    %c0_5 = arith.constant 0 : index
    %c0_6 = arith.constant 0 : index
    %7 = vector.load %arg4[%c0_5, %c0_6] : memref<16x64xf32, #tpu.memory_space<vmem>>, vector<16x64xf32>
    tpu.vector_store %arg4[%c0_5, %c0_6], %6 {strides = array<i32>} : memref<16x64xf32, #tpu.memory_space<vmem>>, vector<16x64xf32>,
    %c0_7 = arith.constant 0 : index
    %c0_8 = arith.constant 0 : index
    %8 = vector.load %arg1[%c0_7, %c0_8] : memref<2x32xf32, #tpu.memory_space<vmem>>, vector<2x16xf32>
    %c0_9 = arith.constant 0 : index
    %c16 = arith.constant 16 : index
    %9 = vector.load %arg1[%c0_9, %c16] : memref<2x32xf32, #tpu.memory_space<vmem>>, vector<2x16xf32>
    %c0_10 = arith.constant 0 : index
    %c0_11 = arith.constant 0 : index
    %10 = tpu.strided_load %arg4[%c0_10, %c0_11] {strides = array<i32: 8, 1>} : memref<16x64xf32, #tpu.memory_space<vmem>>, vector<2x64xf32>
    %cst_12 = arith.constant dense<0.000000e+00> : vector<2x64xf32>
    %11 = tpu.matmul %8, %1, %cst_12 {dimension_numbers = #tpu.dot_dimension_numbers<[1], [0], [0], [1], [0, 0, 1, 1], [], []>} : vector<2x16xf32>, vector<16x64xf32>, vector<2x64xf32> -> vector<2x64xf32>
    %12 = arith.addf %10, %11 : vector<2x64xf32>
    %13 = arith.negf %12 : vector<2x64xf32>
    %14 = math.exp %13 : vector<2x64xf32>
    %cst_13 = arith.constant 1.000000e+00 : f32
    %15 = vector.broadcast %cst_13 : f32 to vector<2x64xf32>
    %16 = arith.addf %15, %14 : vector<2x64xf32>
    %17 = arith.divf %15, %16 : vector<2x64xf32>
    %18 = vector.extract_strided_slice %17 {offsets = [0, 0], sizes = [2, 16], strides = [1, 1]} : vector<2x64xf32> to vector<2x16xf32>
    %19 = vector.extract_strided_slice %17 {offsets = [0, 16], sizes = [2, 16], strides = [1, 1]} : vector<2x64xf32> to vector<2x16xf32>
    %20 = vector.extract_strided_slice %17 {offsets = [0, 32], sizes = [2, 16], strides = [1, 1]} : vector<2x64xf32> to vector<2x16xf32>
    %cst_14 = arith.constant 2.000000e+00 : f32
    %21 = vector.broadcast %cst_14 : f32 to vector<2x16xf32>
    %22 = arith.mulf %21, %20 : vector<2x16xf32>
    %cst_15 = arith.constant 1.000000e+00 : f32
    %23 = vector.broadcast %cst_15 : f32 to vector<2x16xf32>
    %24 = arith.subf %22, %23 : vector<2x16xf32>
    %25 = vector.extract_strided_slice %17 {offsets = [0, 48], sizes = [2, 16], strides = [1, 1]} : vector<2x64xf32> to vector<2x16xf32>
    %26 = arith.mulf %19, %9 : vector<2x16xf32>
    %27 = arith.mulf %18, %24 : vector<2x16xf32>
    %28 = arith.addf %26, %27 : vector<2x16xf32>
    %29 = math.tanh %28 : vector<2x16xf32>
    %30 = arith.mulf %25, %29 : vector<2x16xf32>
    %c1 = arith.constant 1 : index
    %c0_16 = arith.constant 0 : index
    %31 = tpu.strided_load %arg4[%c1, %c0_16] {strides = array<i32: 8, 1>} : memref<16x64xf32, #tpu.memory_space<vmem>>, vector<2x64xf32>
    %cst_17 = arith.constant dense<0.000000e+00> : vector<2x64xf32>
    %32 = tpu.matmul %30, %1, %cst_17 {dimension_numbers = #tpu.dot_dimension_numbers<[1], [0], [0], [1], [0, 0, 1, 1], [], []>} : vector<2x16xf32>, vector<16x64xf32>, vector<2x64xf32> -> vector<2x64xf32>
    %33 = arith.addf %31, %32 : vector<2x64xf32>
    %34 = arith.negf %33 : vector<2x64xf32>
    %35 = math.exp %34 : vector<2x64xf32>
    %cst_18 = arith.constant 1.000000e+00 : f32
    %36 = vector.broadcast %cst_18 : f32 to vector<2x64xf32>
    %37 = arith.addf %36, %35 : vector<2x64xf32>
    %38 = arith.divf %36, %37 : vector<2x64xf32>
    %39 = vector.extract_strided_slice %38 {offsets = [0, 0], sizes = [2, 16], strides = [1, 1]} : vector<2x64xf32> to vector<2x16xf32>
    %40 = vector.extract_strided_slice %38 {offsets = [0, 16], sizes = [2, 16], strides = [1, 1]} : vector<2x64xf32> to vector<2x16xf32>
    %41 = vector.extract_strided_slice %38 {offsets = [0, 32], sizes = [2, 16], strides = [1, 1]} : vector<2x64xf32> to vector<2x16xf32>
    %cst_19 = arith.constant 2.000000e+00 : f32
    %42 = vector.broadcast %cst_19 : f32 to vector<2x16xf32>
    %43 = arith.mulf %42, %41 : vector<2x16xf32>
    %cst_20 = arith.constant 1.000000e+00 : f32
    %44 = vector.broadcast %cst_20 : f32 to vector<2x16xf32>
    %45 = arith.subf %43, %44 : vector<2x16xf32>
    %46 = vector.extract_strided_slice %38 {offsets = [0, 48], sizes = [2, 16], strides = [1, 1]} : vector<2x64xf32> to vector<2x16xf32>
    %47 = arith.mulf %40, %28 : vector<2x16xf32>
    %48 = arith.mulf %39, %45 : vector<2x16xf32>
    %49 = arith.addf %47, %48 : vector<2x16xf32>
    %50 = math.tanh %49 : vector<2x16xf32>
    %51 = arith.mulf %46, %50 : vector<2x16xf32>
    %c2 = arith.constant 2 : index
    %c0_21 = arith.constant 0 : index
    %52 = tpu.strided_load %arg4[%c2, %c0_21] {strides = array<i32: 8, 1>} : memref<16x64xf32, #tpu.memory_space<vmem>>, vector<2x64xf32>
    %cst_22 = arith.constant dense<0.000000e+00> : vector<2x64xf32>
    %53 = tpu.matmul %51, %1, %cst_22 {dimension_numbers = #tpu.dot_dimension_numbers<[1], [0], [0], [1], [0, 0, 1, 1], [], []>} : vector<2x16xf32>, vector<16x64xf32>, vector<2x64xf32> -> vector<2x64xf32>
    %54 = arith.addf %52, %53 : vector<2x64xf32>
    %55 = arith.negf %54 : vector<2x64xf32>
    %56 = math.exp %55 : vector<2x64xf32>
    %cst_23 = arith.constant 1.000000e+00 : f32
    %57 = vector.broadcast %cst_23 : f32 to vector<2x64xf32>
    %58 = arith.addf %57, %56 : vector<2x64xf32>
    %59 = arith.divf %57, %58 : vector<2x64xf32>
    %60 = vector.extract_strided_slice %59 {offsets = [0, 0], sizes = [2, 16], strides = [1, 1]} : vector<2x64xf32> to vector<2x16xf32>
    %61 = vector.extract_strided_slice %59 {offsets = [0, 16], sizes = [2, 16], strides = [1, 1]} : vector<2x64xf32> to vector<2x16xf32>
    %62 = vector.extract_strided_slice %59 {offsets = [0, 32], sizes = [2, 16], strides = [1, 1]} : vector<2x64xf32> to vector<2x16xf32>
    %cst_24 = arith.constant 2.000000e+00 : f32
    %63 = vector.broadcast %cst_24 : f32 to vector<2x16xf32>
    %64 = arith.mulf %63, %62 : vector<2x16xf32>
    %cst_25 = arith.constant 1.000000e+00 : f32
    %65 = vector.broadcast %cst_25 : f32 to vector<2x16xf32>
    %66 = arith.subf %64, %65 : vector<2x16xf32>
    %67 = vector.extract_strided_slice %59 {offsets = [0, 48], sizes = [2, 16], strides = [1, 1]} : vector<2x64xf32> to vector<2x16xf32>
    %68 = arith.mulf %61, %49 : vector<2x16xf32>
    %69 = arith.mulf %60, %66 : vector<2x16xf32>
    %70 = arith.addf %68, %69 : vector<2x16xf32>
    %71 = math.tanh %70 : vector<2x16xf32>
    %72 = arith.mulf %67, %71 : vector<2x16xf32>
    %c3 = arith.constant 3 : index
    %c0_26 = arith.constant 0 : index
    %73 = tpu.strided_load %arg4[%c3, %c0_26] {strides = array<i32: 8, 1>} : memref<16x64xf32, #tpu.memory_space<vmem>>, vector<2x64xf32>
    %cst_27 = arith.constant dense<0.000000e+00> : vector<2x64xf32>
    %74 = tpu.matmul %72, %1, %cst_27 {dimension_numbers = #tpu.dot_dimension_numbers<[1], [0], [0], [1], [0, 0, 1, 1], [], []>} : vector<2x16xf32>, vector<16x64xf32>, vector<2x64xf32> -> vector<2x64xf32>
    %75 = arith.addf %73, %74 : vector<2x64xf32>
    %76 = arith.negf %75 : vector<2x64xf32>
    %77 = math.exp %76 : vector<2x64xf32>
    %cst_28 = arith.constant 1.000000e+00 : f32
    %78 = vector.broadcast %cst_28 : f32 to vector<2x64xf32>
    %79 = arith.addf %78, %77 : vector<2x64xf32>
    %80 = arith.divf %78, %79 : vector<2x64xf32>
    %81 = vector.extract_strided_slice %80 {offsets = [0, 0], sizes = [2, 16], strides = [1, 1]} : vector<2x64xf32> to vector<2x16xf32>
    %82 = vector.extract_strided_slice %80 {offsets = [0, 16], sizes = [2, 16], strides = [1, 1]} : vector<2x64xf32> to vector<2x16xf32>
    %83 = vector.extract_strided_slice %80 {offsets = [0, 32], sizes = [2, 16], strides = [1, 1]} : vector<2x64xf32> to vector<2x16xf32>
    %cst_29 = arith.constant 2.000000e+00 : f32
    %84 = vector.broadcast %cst_29 : f32 to vector<2x16xf32>
    %85 = arith.mulf %84, %83 : vector<2x16xf32>
    %cst_30 = arith.constant 1.000000e+00 : f32
    %86 = vector.broadcast %cst_30 : f32 to vector<2x16xf32>
    %87 = arith.subf %85, %86 : vector<2x16xf32>
    %88 = vector.extract_strided_slice %80 {offsets = [0, 48], sizes = [2, 16], strides = [1, 1]} : vector<2x64xf32> to vector<2x16xf32>
    %89 = arith.mulf %82, %70 : vector<2x16xf32>
    %90 = arith.mulf %81, %87 : vector<2x16xf32>
    %91 = arith.addf %89, %90 : vector<2x16xf32>
    %92 = math.tanh %91 : vector<2x16xf32>
    %93 = arith.mulf %88, %92 : vector<2x16xf32>
    %c4 = arith.constant 4 : index
    %c0_31 = arith.constant 0 : index
    %94 = tpu.strided_load %arg4[%c4, %c0_31] {strides = array<i32: 8, 1>} : memref<16x64xf32, #tpu.memory_space<vmem>>, vector<2x64xf32>
    %cst_32 = arith.constant dense<0.000000e+00> : vector<2x64xf32>
    %95 = tpu.matmul %93, %1, %cst_32 {dimension_numbers = #tpu.dot_dimension_numbers<[1], [0], [0], [1], [0, 0, 1, 1], [], []>} : vector<2x16xf32>, vector<16x64xf32>, vector<2x64xf32> -> vector<2x64xf32>
    %96 = arith.addf %94, %95 : vector<2x64xf32>
    %97 = arith.negf %96 : vector<2x64xf32>
    %98 = math.exp %97 : vector<2x64xf32>
    %cst_33 = arith.constant 1.000000e+00 : f32
    %99 = vector.broadcast %cst_33 : f32 to vector<2x64xf32>
    %100 = arith.addf %99, %98 : vector<2x64xf32>
    %101 = arith.divf %99, %100 : vector<2x64xf32>
    %102 = vector.extract_strided_slice %101 {offsets = [0, 0], sizes = [2, 16], strides = [1, 1]} : vector<2x64xf32> to vector<2x16xf32>
    %103 = vector.extract_strided_slice %101 {offsets = [0, 16], sizes = [2, 16], strides = [1, 1]} : vector<2x64xf32> to vector<2x16xf32>
    %104 = vector.extract_strided_slice %101 {offsets = [0, 32], sizes = [2, 16], strides = [1, 1]} : vector<2x64xf32> to vector<2x16xf32>
    %cst_34 = arith.constant 2.000000e+00 : f32
    %105 = vector.broadcast %cst_34 : f32 to vector<2x16xf32>
    %106 = arith.mulf %105, %104 : vector<2x16xf32>
    %cst_35 = arith.constant 1.000000e+00 : f32
    %107 = vector.broadcast %cst_35 : f32 to vector<2x16xf32>
    %108 = arith.subf %106, %107 : vector<2x16xf32>
    %109 = vector.extract_strided_slice %101 {offsets = [0, 48], sizes = [2, 16], strides = [1, 1]} : vector<2x64xf32> to vector<2x16xf32>
    %110 = arith.mulf %103, %91 : vector<2x16xf32>
    %111 = arith.mulf %102, %108 : vector<2x16xf32>
    %112 = arith.addf %110, %111 : vector<2x16xf32>
    %113 = math.tanh %112 : vector<2x16xf32>
    %114 = arith.mulf %109, %113 : vector<2x16xf32>
    %c5 = arith.constant 5 : index
    %c0_36 = arith.constant 0 : index
    %115 = tpu.strided_load %arg4[%c5, %c0_36] {strides = array<i32: 8, 1>} : memref<16x64xf32, #tpu.memory_space<vmem>>, vector<2x64xf32>
    %cst_37 = arith.constant dense<0.000000e+00> : vector<2x64xf32>
    %116 = tpu.matmul %114, %1, %cst_37 {dimension_numbers = #tpu.dot_dimension_numbers<[1], [0], [0], [1], [0, 0, 1, 1], [], []>} : vector<2x16xf32>, vector<16x64xf32>, vector<2x64xf32> -> vector<2x64xf32>
    %117 = arith.addf %115, %116 : vector<2x64xf32>
    %118 = arith.negf %117 : vector<2x64xf32>
    %119 = math.exp %118 : vector<2x64xf32>
    %cst_38 = arith.constant 1.000000e+00 : f32
    %120 = vector.broadcast %cst_38 : f32 to vector<2x64xf32>
    %121 = arith.addf %120, %119 : vector<2x64xf32>
    %122 = arith.divf %120, %121 : vector<2x64xf32>
    %123 = vector.extract_strided_slice %122 {offsets = [0, 0], sizes = [2, 16], strides = [1, 1]} : vector<2x64xf32> to vector<2x16xf32>
    %124 = vector.extract_strided_slice %122 {offsets = [0, 16], sizes = [2, 16], strides = [1, 1]} : vector<2x64xf32> to vector<2x16xf32>
    %125 = vector.extract_strided_slice %122 {offsets = [0, 32], sizes = [2, 16], strides = [1, 1]} : vector<2x64xf32> to vector<2x16xf32>
    %cst_39 = arith.constant 2.000000e+00 : f32
    %126 = vector.broadcast %cst_39 : f32 to vector<2x16xf32>
    %127 = arith.mulf %126, %125 : vector<2x16xf32>
    %cst_40 = arith.constant 1.000000e+00 : f32
    %128 = vector.broadcast %cst_40 : f32 to vector<2x16xf32>
    %129 = arith.subf %127, %128 : vector<2x16xf32>
    %130 = vector.extract_strided_slice %122 {offsets = [0, 48], sizes = [2, 16], strides = [1, 1]} : vector<2x64xf32> to vector<2x16xf32>
    %131 = arith.mulf %124, %112 : vector<2x16xf32>
    %132 = arith.mulf %123, %129 : vector<2x16xf32>
    %133 = arith.addf %131, %132 : vector<2x16xf32>
    %134 = math.tanh %133 : vector<2x16xf32>
    %135 = arith.mulf %130, %134 : vector<2x16xf32>
    %c6 = arith.constant 6 : index
    %c0_41 = arith.constant 0 : index
    %136 = tpu.strided_load %arg4[%c6, %c0_41] {strides = array<i32: 8, 1>} : memref<16x64xf32, #tpu.memory_space<vmem>>, vector<2x64xf32>
    %cst_42 = arith.constant dense<0.000000e+00> : vector<2x64xf32>
    %137 = tpu.matmul %135, %1, %cst_42 {dimension_numbers = #tpu.dot_dimension_numbers<[1], [0], [0], [1], [0, 0, 1, 1], [], []>} : vector<2x16xf32>, vector<16x64xf32>, vector<2x64xf32> -> vector<2x64xf32>
    %138 = arith.addf %136, %137 : vector<2x64xf32>
    %139 = arith.negf %138 : vector<2x64xf32>
    %140 = math.exp %139 : vector<2x64xf32>
    %cst_43 = arith.constant 1.000000e+00 : f32
    %141 = vector.broadcast %cst_43 : f32 to vector<2x64xf32>
    %142 = arith.addf %141, %140 : vector<2x64xf32>
    %143 = arith.divf %141, %142 : vector<2x64xf32>
    %144 = vector.extract_strided_slice %143 {offsets = [0, 0], sizes = [2, 16], strides = [1, 1]} : vector<2x64xf32> to vector<2x16xf32>
    %145 = vector.extract_strided_slice %143 {offsets = [0, 16], sizes = [2, 16], strides = [1, 1]} : vector<2x64xf32> to vector<2x16xf32>
    %146 = vector.extract_strided_slice %143 {offsets = [0, 32], sizes = [2, 16], strides = [1, 1]} : vector<2x64xf32> to vector<2x16xf32>
    %cst_44 = arith.constant 2.000000e+00 : f32
    %147 = vector.broadcast %cst_44 : f32 to vector<2x16xf32>
    %148 = arith.mulf %147, %146 : vector<2x16xf32>
    %cst_45 = arith.constant 1.000000e+00 : f32
    %149 = vector.broadcast %cst_45 : f32 to vector<2x16xf32>
    %150 = arith.subf %148, %149 : vector<2x16xf32>
    %151 = vector.extract_strided_slice %143 {offsets = [0, 48], sizes = [2, 16], strides = [1, 1]} : vector<2x64xf32> to vector<2x16xf32>
    %152 = arith.mulf %145, %133 : vector<2x16xf32>
    %153 = arith.mulf %144, %150 : vector<2x16xf32>
    %154 = arith.addf %152, %153 : vector<2x16xf32>
    %155 = math.tanh %154 : vector<2x16xf32>
    %156 = arith.mulf %151, %155 : vector<2x16xf32>
    %c7 = arith.constant 7 : index
    %c0_46 = arith.constant 0 : index
    %157 = tpu.strided_load %arg4[%c7, %c0_46] {strides = array<i32: 8, 1>} : memref<16x64xf32, #tpu.memory_space<vmem>>, vector<2x64xf32>
    %cst_47 = arith.constant dense<0.000000e+00> : vector<2x64xf32>
    %158 = tpu.matmul %156, %1, %cst_47 {dimension_numbers = #tpu.dot_dimension_numbers<[1], [0], [0], [1], [0, 0, 1, 1], [], []>} : vector<2x16xf32>, vector<16x64xf32>, vector<2x64xf32> -> vector<2x64xf32>
    %159 = arith.addf %157, %158 : vector<2x64xf32>
    %160 = arith.negf %159 : vector<2x64xf32>
    %161 = math.exp %160 : vector<2x64xf32>
    %cst_48 = arith.constant 1.000000e+00 : f32
    %162 = vector.broadcast %cst_48 : f32 to vector<2x64xf32>
    %163 = arith.addf %162, %161 : vector<2x64xf32>
    %164 = arith.divf %162, %163 : vector<2x64xf32>
    %165 = vector.extract_strided_slice %164 {offsets = [0, 0], sizes = [2, 16], strides = [1, 1]} : vector<2x64xf32> to vector<2x16xf32>
    %166 = vector.extract_strided_slice %164 {offsets = [0, 16], sizes = [2, 16], strides = [1, 1]} : vector<2x64xf32> to vector<2x16xf32>
    %167 = vector.extract_strided_slice %164 {offsets = [0, 32], sizes = [2, 16], strides = [1, 1]} : vector<2x64xf32> to vector<2x16xf32>
    %cst_49 = arith.constant 2.000000e+00 : f32
    %168 = vector.broadcast %cst_49 : f32 to vector<2x16xf32>
    %169 = arith.mulf %168, %167 : vector<2x16xf32>
    %cst_50 = arith.constant 1.000000e+00 : f32
    %170 = vector.broadcast %cst_50 : f32 to vector<2x16xf32>
    %171 = arith.subf %169, %170 : vector<2x16xf32>
    %172 = vector.extract_strided_slice %164 {offsets = [0, 48], sizes = [2, 16], strides = [1, 1]} : vector<2x64xf32> to vector<2x16xf32>
    %173 = arith.mulf %166, %154 : vector<2x16xf32>
    %174 = arith.mulf %165, %171 : vector<2x16xf32>
    %175 = arith.addf %173, %174 : vector<2x16xf32>
    %176 = math.tanh %175 : vector<2x16xf32>
    %177 = arith.mulf %172, %176 : vector<2x16xf32>
    %178 = tpu.concatenate %30, %51, %72, %93, %114, %135, %156, %177 in 0 : vector<2x16xf32>, vector<2x16xf32>, vector<2x16xf32>, vector<2x16xf32>, vector<2x16xf32>, vector<2x16xf32>, vector<2x16xf32>, vector<2x16xf32> -> vector<16x16xf32>
    %c49 = arith.constant 49 : index
    %c0_51 = arith.constant 0 : index
    %179 = vector.load %arg2[%c49, %c0_51] : memref<66x64xf32, #tpu.memory_space<vmem>>, vector<16x16xf32>
    %c49_52 = arith.constant 49 : index
    %c16_53 = arith.constant 16 : index
    %180 = vector.load %arg2[%c49_52, %c16_53] : memref<66x64xf32, #tpu.memory_space<vmem>>, vector<16x1xf32>
    %c65 = arith.constant 65 : index
    %c0_54 = arith.constant 0 : index
    %181 = vector.load %arg2[%c65, %c0_54] : memref<66x64xf32, #tpu.memory_space<vmem>>, vector<1x64xf32>
    %182 = vector.extract_strided_slice %181 {offsets = [0, 0], sizes = [1, 16], strides = [1, 1]} : vector<1x64xf32> to vector<1x16xf32>
    %183 = vector.extract_strided_slice %181 {offsets = [0, 16], sizes = [1, 16], strides = [1, 1]} : vector<1x64xf32> to vector<1x16xf32>
    %184 = vector.extract_strided_slice %181 {offsets = [0, 32], sizes = [1, 16], strides = [1, 1]} : vector<1x64xf32> to vector<1x16xf32>
    %185 = vector.extract_strided_slice %181 {offsets = [0, 48], sizes = [1, 1], strides = [1, 1]} : vector<1x64xf32> to vector<1x1xf32>
    %cst_55 = arith.constant dense<0.000000e+00> : vector<16x16xf32>
    %186 = tpu.matmul %178, %179, %cst_55 {dimension_numbers = #tpu.dot_dimension_numbers<[1], [0], [0], [1], [0, 0, 1, 1], [], []>} : vector<16x16xf32>, vector<16x16xf32>, vector<16x16xf32> -> vector<16x16xf32>
    %187 = vector.broadcast %182 : vector<1x16xf32> to vector<16x16xf32>
    %188 = arith.addf %186, %187 : vector<16x16xf32>
    %cst_56 = arith.constant 0.000000e+00 : f32
    %189 = vector.broadcast %cst_56 : f32 to vector<16x16xf32>
    %190 = arith.maximumf %188, %189 : vector<16x16xf32>
    %cst_57 = arith.constant dense<0.000000e+00> : vector<16xf32>
    %191 = vector.multi_reduction <add>, %190, %cst_57 [0] : vector<16x16xf32> to vector<16xf32>
    %192 = vector.shape_cast %191 : vector<16xf32> to vector<1x16xf32>
    %193 = arith.mulf %190, %190 : vector<16x16xf32>
    %cst_58 = arith.constant dense<0.000000e+00> : vector<16xf32>
    %194 = vector.multi_reduction <add>, %193, %cst_58 [0] : vector<16x16xf32> to vector<16xf32>
    %195 = vector.shape_cast %194 : vector<16xf32> to vector<1x16xf32>
    %cst_59 = arith.constant 6.250000e-02 : f32
    %196 = vector.broadcast %cst_59 : f32 to vector<1x16xf32>
    %197 = arith.mulf %192, %196 : vector<1x16xf32>
    %cst_60 = arith.constant 6.250000e-02 : f32
    %198 = vector.broadcast %cst_60 : f32 to vector<1x16xf32>
    %199 = arith.mulf %195, %198 : vector<1x16xf32>
    %200 = arith.mulf %197, %197 : vector<1x16xf32>
    %201 = arith.subf %199, %200 : vector<1x16xf32>
    %202 = vector.extract_strided_slice %190 {offsets = [14, 0], sizes = [2, 16], strides = [1, 1]} : vector<16x16xf32> to vector<2x16xf32>
    %203 = vector.broadcast %197 : vector<1x16xf32> to vector<2x16xf32>
    %204 = arith.subf %202, %203 : vector<2x16xf32>
    %cst_61 = arith.constant 9.99999974E-6 : f32
    %205 = vector.broadcast %cst_61 : f32 to vector<1x16xf32>
    %206 = arith.addf %201, %205 : vector<1x16xf32>
    %207 = math.rsqrt %206 : vector<1x16xf32>
    %208 = arith.mulf %207, %183 : vector<1x16xf32>
    %209 = vector.broadcast %208 : vector<1x16xf32> to vector<2x16xf32>
    %210 = arith.mulf %204, %209 : vector<2x16xf32>
    %211 = vector.broadcast %184 : vector<1x16xf32> to vector<2x16xf32>
    %212 = arith.addf %210, %211 : vector<2x16xf32>
    %cst_62 = arith.constant dense<0.000000e+00> : vector<2x1xf32>
    %213 = tpu.matmul %212, %180, %cst_62 {dimension_numbers = #tpu.dot_dimension_numbers<[1], [0], [0], [1], [0, 0, 1, 1], [], []>} : vector<2x16xf32>, vector<16x1xf32>, vector<2x1xf32> -> vector<2x1xf32>
    %214 = vector.broadcast %185 : vector<1x1xf32> to vector<2x1xf32>
    %215 = arith.addf %213, %214 : vector<2x1xf32>
    %216 = arith.negf %215 : vector<2x1xf32>
    %217 = math.exp %216 : vector<2x1xf32>
    %cst_63 = arith.constant 1.000000e+00 : f32
    %218 = vector.broadcast %cst_63 : f32 to vector<2x1xf32>
    %219 = arith.addf %218, %217 : vector<2x1xf32>
    %220 = arith.divf %218, %219 : vector<2x1xf32>
    %c0_64 = arith.constant 0 : index
    %c0_65 = arith.constant 0 : index
    %221 = vector.load %arg3[%c0_64, %c0_65] : memref<2x1xf32, #tpu.memory_space<vmem>>, vector<2x1xf32>
    tpu.vector_store %arg3[%c0_64, %c0_65], %220 {strides = array<i32>} : memref<2x1xf32, #tpu.memory_space<vmem>>, vector<2x1xf32>,
    return
  }
}

</mosaic_0001>

<bundles_post_ra>
// kernel: tpu_custom_call.1
= control target key start
LH: loop header
LB: loop body
LE: loop exit
PB: predicated region body
PF: predicated region fallthrough
CT: control target
= control target key end

     0   :  { %vm27_vm0 = vcmask 261120   ;;  %v1400_v2 = vmov 0.0   ;;  %vm1401_vm1 = vmmov 0   ;;  %vm114_vm2 = vcmask 130048   ;;  %s1402_s30 = smov 96   ;;  %s1403_s4 = smov 16   ;;  %s1594_s2 = inlined_call_operand.vmem [shape: f32[66,64], index: 2, kind: input, shape index: {}]   ;;  %s1595_s0 = inlined_call_operand.vmem [shape: f32[16,32], index: 0, kind: input, shape index: {}]   ;;  %s1596_s1 = inlined_call_operand.vmem [shape: f32[2,32], index: 1, kind: input, shape index: {}]   ;;  %s1597_s3 = inlined_call_operand.vmem [shape: f32[2,1], index: 3, kind: output, shape index: {}]  }
   0x1   :  { %v17_v0 = vld [vmem:[%s1594_s2 + $0x18] sm:$0xff]  ;;  %v16_v1 = vld [vmem:[%s1594_s2 + $0x10] sm:$0xff]  ;;  %1269 = vmatprep.subr.mxu1 %v1400_v2  ;;  %1273 = vmatprep.mubr.msk.f32.mxu1 %vm1401_vm1, %v1400_v2  ;;  %v21_v3 = vld [vmem:[%s1595_s0] sm:$0xff]  ;;  %vm109_vm3 = vcmask 523264   ;;  %s1404_s5 = smov 32   ;;  %s1405_s6 = smov 80  }
   0x2   :  { %1258 = vmatprep.subr.mxu0 %v17_v0  ;;  %v15_v4 = vld [vmem:[%s1594_s2 + $0x8] sm:$0xff]  ;;  %1266 = vmatprep.mubr.msk.f32.mxu0 %vm27_vm0, %v21_v3  ;;  %v1451_v6 = vld [vmem:[%s1594_s2 + $0x20] sm:$0xff]  ;;  %v1190_v11 = vld [vmem:[%s1594_s2 + $0x30] ss:$0 sm:$0xff]  ;;  %vm948_vm4 = vcmask 1041408   ;;  %vm950_vm5 = vcmask 1043456  }
   0x3   :  { %1259 = vmatpush3.msra.mxu0 %v17_v0  ;;  %v1446_v5 = vld [vmem:[%s1594_s2 + $0x28] sm:$0xff]  ;;  %v112_v7 = vld [vmem:[%s1596_s1] sm:$0x3]  ;;  %vm952_vm6 = vcmask 1045504   ;;  %s1406_s13 = smov 112   ;;  %vm1184_vm7 = vcmask 1024  }
   0x4   :  { %1260 = vmatprep.subr.mxu0 %v16_v1  ;;  %1270 = vmatpush3.msra.mxu1 %v1446_v5  ;;  %v14_v8 = vld [vmem:[%s1594_s2] sm:$0xff]  ;;  %v22_v9 = vld [vmem:[%s1595_s0 + $0x8] sm:$0xff] }
   0x5   :  { %1261 = vmatpush3.msra.mxu0 %v16_v1  ;;  %1271 = vmatprep.subr.mxu1 %v1400_v2 }
   0x6   :  { %1262 = vmatprep.subr.mxu0 %v15_v4  ;;  %1272 = vmatpush3.msra.mxu1 %v1451_v6 }
   0x7   :  { %1263 = vmatpush3.msra.mxu0 %v15_v4  ;;  %1274 = vmatmul.mubr.msk.f32.vlgmr.msra.gmra.mxu1 %vm114_vm2, %v112_v7 }
   0x8   :  { %1264 = vmatprep.subr.mxu0 %v14_v8  ;;  %1276 = vmatprep.subr.mxu1 %v1400_v2 }
   0x9   :  { %1265 = vmatpush3.msra.mxu0 %v14_v8  ;;  %1277 = vmatpush3.msra.mxu1 %v1446_v5 }
   0xa   :  { %1267 = vmatmul.mubr.msk.f32.vlgmr.msra.gmra.mxu0 %vm27_vm0, %v22_v9  ;;  %1278 = vmatprep.subr.mxu1 %v1400_v2 }
   0xb   :  { %1279 = vmatpush3.msra.mxu1 %v1451_v6  ;;  %1280 = vmatprep.mubr.msk.f32.mxu1 %vm1401_vm1, %v1400_v2 }
   0xc   :  { %1283 = vmatprep.subr.mxu0 %v1400_v2  ;;  %1287 = vmatprep.mubr.msk.f32.mxu0 %vm1401_vm1, %v1400_v2 }
   0xd   :  { %1284 = vmatpush3.msra.mxu0 %v1446_v5  ;;  %1290 = vmatprep.subr.mxu1 %v1400_v2 }
   0xe   :  { %1285 = vmatprep.subr.mxu0 %v1400_v2 }
   0xf   :  { %1286 = vmatpush3.msra.mxu0 %v1451_v6 }
  0x10   :  { %1297 = vmatprep.subr.mxu0 %v1400_v2 }
  0xc7   :  { %v184_v10 = vpop.f32.mrf.mxu1 }
  0xc9   :  { %v1275_v12 = vpop.f32.mrf.mxu1 }
  0xca   :  { %v1268_v13 = vpop.f32.mrf.mxu0 }
  0xcb   :  { %v106_v14 = vadd.f32 %v1268_v13, %v1190_v11 }
  0xcc   :  { %v100_v15 = vpop.f32.mrf.mxu0 }
  0xcd   :  { %111 = vst.msk [vmem:[#allocation2 + $0x8] sm:$0xff] %vm109_vm3, %v106_v14  ;;  %v101_v16 = vadd.f32 %v1190_v11, %v100_v15 }
  0xcf   :  { %110 = vst.msk [vmem:[#allocation2] sm:$0xff] %vm109_vm3, %v101_v16 }
  0xd6   :  { %v113_v17 = vld [vmem:[#allocation2] ss:$8 sm:$0x3]  ;;  %v215_v34 = vld [vmem:[#allocation2 + $0x1] ss:$8 sm:$0x3] }
  0xd7   :  { %v188_v18 = vadd.f32 %v184_v10, %v113_v17  ;;  %v318_v53 = vld [vmem:[#allocation2 + $0x2] ss:$8 sm:$0x3]  ;;  %v421_v15 = vld [vmem:[#allocation2 + $0x3] ss:$8 sm:$0x3] }
  0xd9   :  { %v1194_v19 = vmul.f32 -1.442695, %v188_v18 }
  0xdb   :  { %1346 = vpow2.f32 %v1194_v19 }
  0xe8   :  { %v1347_v20 = vpop.eup %1346 }
  0xe9   :  { %v192_v21 = vadd.f32 1.0, %v1347_v20 }
  0xeb   :  { %1348 = vrcp.f32 %v192_v21 }
  0xf8   :  { %v1349_v22 = vpop.eup %1348 }
  0xf9   :  { %v195_v23 = vmul.f32 2.0, %v1349_v22  ;;  %v197_v27 = vmul.f32 %v1349_v22, %v112_v7 }
  0xfb   :  { %v1195_v24 = vadd.f32 -1.0, %v195_v23 }
  0xfd   :  { %199 = vrot.lane.b32.xlu0 %v1195_v24, %s1402_s30 }
 0x16f   :  { %v200_v25 = vpop.permute.xlu0 %199 }
 0x170   :  { %v202_v26 = vmul.f32 %v1349_v22, %v200_v25 }
 0x172   :  { %204 = vrot.lane.b32.xlu0 %v202_v26, %s1403_s4 }
 0x1e4   :  { %v205_v28 = vpop.permute.xlu0 %204 }
 0x1e5   :  { %v207_v29 = vadd.f32 %v205_v28, %v197_v27 }
 0x1e7   :  { %1350 = vtanh.f32 %v207_v29 }
 0x1f4   :  { %v1351_v30 = vpop.eup %1350 }
 0x1f5   :  { %210 = vrot.lane.b32.xlu1 %v1351_v30, %s1404_s5 }
 0x267   :  { %v211_v31 = vpop.permute.xlu1 %210 }
 0x268   :  { %v1487_v32 = vmul.f32 %v1349_v22, %v211_v31 }
 0x26a   :  { %217 = vrot.lane.b32.xlu1 %v1487_v32, %s1405_s6 }
 0x2dc   :  { %v218_v33 = vpop.permute.xlu1 %217 }
 0x2dd   :  { %1281 = vmatmul.mubr.msk.f32.vlgmr.msra.gmra.mxu1 %vm114_vm2, %v218_v33 }
 0x2de   :  { %1291 = vmatpush3.msra.mxu1 %v1446_v5  ;;  %1294 = vmatprep.mubr.msk.f32.mxu1 %vm1401_vm1, %v1400_v2 }
 0x2df   :  { %1292 = vmatprep.subr.mxu1 %v1400_v2 }
 0x2e0   :  { %1293 = vmatpush3.msra.mxu1 %v1451_v6 }
 0x2e1   :  { %1304 = vmatprep.subr.mxu1 %v1400_v2 }
 0x39d   :  { %v287_v35 = vpop.f32.mrf.mxu1 }
 0x39e   :  { %v291_v36 = vadd.f32 %v287_v35, %v215_v34 }
 0x39f   :  { %v1282_v37 = vpop.f32.mrf.mxu1 }
 0x3a0   :  { %v1197_v38 = vmul.f32 -1.442695, %v291_v36  ;;  %v524_v36 = vld [vmem:[#allocation2 + $0x4] ss:$8 sm:$0x3] }
 0x3a2   :  { %1352 = vpow2.f32 %v1197_v38 }
 0x3af   :  { %v1353_v39 = vpop.eup %1352 }
 0x3b0   :  { %v295_v40 = vadd.f32 1.0, %v1353_v39 }
 0x3b2   :  { %1354 = vrcp.f32 %v295_v40 }
 0x3bf   :  { %v1355_v41 = vpop.eup %1354 }
 0x3c0   :  { %v298_v42 = vmul.f32 2.0, %v1355_v41  ;;  %v300_v46 = vmul.f32 %v1355_v41, %v207_v29 }
 0x3c2   :  { %v1198_v43 = vadd.f32 -1.0, %v298_v42 }
 0x3c4   :  { %302 = vrot.lane.b32.xlu0 %v1198_v43, %s1402_s30 }
 0x436   :  { %v303_v44 = vpop.permute.xlu0 %302 }
 0x437   :  { %v305_v45 = vmul.f32 %v1355_v41, %v303_v44 }
 0x439   :  { %307 = vrot.lane.b32.xlu1 %v305_v45, %s1403_s4 }
 0x4ab   :  { %v308_v47 = vpop.permute.xlu1 %307 }
 0x4ac   :  { %v310_v48 = vadd.f32 %v308_v47, %v300_v46 }
 0x4ae   :  { %1356 = vtanh.f32 %v310_v48 }
 0x4bb   :  { %v1357_v49 = vpop.eup %1356 }
 0x4bc   :  { %313 = vrot.lane.b32.xlu0 %v1357_v49, %s1404_s5 }
 0x52e   :  { %v314_v50 = vpop.permute.xlu0 %313 }
 0x52f   :  { %v316_v51 = vmul.f32 %v1355_v41, %v314_v50 }
 0x531   :  { %320 = vrot.lane.b32.xlu1 %v316_v51, %s1405_s6  ;;  %v935_v8 = vrot.slane %v316_v51, 6 }
 0x533   :  { %v949_v12 = vsel %vm948_vm4, %v1487_v32, %v935_v8 }
 0x5a3   :  { %v321_v52 = vpop.permute.xlu1 %320 }
 0x5a4   :  { %1288 = vmatmul.mubr.msk.f32.vlgmr.msra.gmra.mxu0 %vm114_vm2, %v321_v52 }
 0x5a5   :  { %1298 = vmatpush3.msra.mxu0 %v1446_v5  ;;  %1301 = vmatprep.mubr.msk.f32.mxu0 %vm1401_vm1, %v1400_v2 }
 0x5a6   :  { %1299 = vmatprep.subr.mxu0 %v1400_v2 }
 0x5a7   :  { %1300 = vmatpush3.msra.mxu0 %v1451_v6 }
 0x5a8   :  { %1311 = vmatprep.subr.mxu0 %v1400_v2 }
 0x664   :  { %v390_v54 = vpop.f32.mrf.mxu0 }
 0x665   :  { %v394_v55 = vadd.f32 %v390_v54, %v318_v53 }
 0x666   :  { %v1289_v56 = vpop.f32.mrf.mxu0 }
 0x667   :  { %v1200_v57 = vmul.f32 -1.442695, %v394_v55  ;;  %v627_v55 = vld [vmem:[#allocation2 + $0x5] ss:$8 sm:$0x3] }
 0x669   :  { %1358 = vpow2.f32 %v1200_v57 }
 0x676   :  { %v1359_v58 = vpop.eup %1358 }
 0x677   :  { %v398_v59 = vadd.f32 1.0, %v1359_v58 }
 0x679   :  { %1360 = vrcp.f32 %v398_v59 }
 0x686   :  { %v1361_v60 = vpop.eup %1360 }
 0x687   :  { %v401_v61 = vmul.f32 2.0, %v1361_v60  ;;  %v403_v1 = vmul.f32 %v1361_v60, %v310_v48 }
 0x689   :  { %v1201_v62 = vadd.f32 -1.0, %v401_v61 }
 0x68b   :  { %405 = vrot.lane.b32.xlu0 %v1201_v62, %s1402_s30 }
 0x6fd   :  { %v406_v63 = vpop.permute.xlu0 %405 }
 0x6fe   :  { %v408_v0 = vmul.f32 %v1361_v60, %v406_v63 }
 0x700   :  { %410 = vrot.lane.b32.xlu1 %v408_v0, %s1403_s4 }
 0x772   :  { %v411_v3 = vpop.permute.xlu1 %410 }
 0x773   :  { %v413_v4 = vadd.f32 %v411_v3, %v403_v1 }
 0x775   :  { %1362 = vtanh.f32 %v413_v4 }
 0x782   :  { %v1363_v7 = vpop.eup %1362 }
 0x783   :  { %416 = vrot.lane.b32.xlu0 %v1363_v7, %s1404_s5 }
 0x7f5   :  { %v417_v9 = vpop.permute.xlu0 %416 }
 0x7f6   :  { %v419_v10 = vmul.f32 %v1361_v60, %v417_v9 }
 0x7f8   :  { %v937_v11 = vrot.slane %v419_v10, 4  ;;  %423 = vrot.lane.b32.xlu1 %v419_v10, %s1405_s6 }
 0x7fa   :  { %v951_v13 = vsel %vm950_vm5, %v949_v12, %v937_v11  ;;  %v730_v11 = vld [vmem:[#allocation2 + $0x6] ss:$8 sm:$0x3] }
 0x86a   :  { %v424_v14 = vpop.permute.xlu1 %423 }
 0x86b   :  { %1295 = vmatmul.mubr.msk.f32.vlgmr.msra.gmra.mxu1 %vm114_vm2, %v424_v14 }
 0x86c   :  { %1305 = vmatpush3.msra.mxu1 %v1446_v5  ;;  %1308 = vmatprep.mubr.msk.f32.mxu1 %vm1401_vm1, %v1400_v2 }
 0x86d   :  { %1306 = vmatprep.subr.mxu1 %v1400_v2 }
 0x86e   :  { %1307 = vmatpush3.msra.mxu1 %v1451_v6 }
 0x86f   :  { %1318 = vmatprep.subr.mxu1 %v1400_v2 }
 0x92b   :  { %v493_v16 = vpop.f32.mrf.mxu1 }
 0x92c   :  { %v497_v17 = vadd.f32 %v493_v16, %v421_v15 }
 0x92d   :  { %v1296_v18 = vpop.f32.mrf.mxu1 }
 0x92e   :  { %v1203_v19 = vmul.f32 -1.442695, %v497_v17 }
 0x930   :  { %1364 = vpow2.f32 %v1203_v19 }
 0x93d   :  { %v1365_v20 = vpop.eup %1364 }
 0x93e   :  { %v501_v21 = vadd.f32 1.0, %v1365_v20 }
 0x940   :  { %1366 = vrcp.f32 %v501_v21 }
 0x94d   :  { %v1367_v22 = vpop.eup %1366 }
 0x94e   :  { %v504_v23 = vmul.f32 2.0, %v1367_v22  ;;  %v506_v27 = vmul.f32 %v1367_v22, %v413_v4 }
 0x950   :  { %v1204_v24 = vadd.f32 -1.0, %v504_v23 }
 0x952   :  { %508 = vrot.lane.b32.xlu0 %v1204_v24, %s1402_s30 }
 0x9c4   :  { %v509_v25 = vpop.permute.xlu0 %508 }
 0x9c5   :  { %v511_v26 = vmul.f32 %v1367_v22, %v509_v25 }
 0x9c7   :  { %513 = vrot.lane.b32.xlu1 %v511_v26, %s1403_s4 }
 0xa39   :  { %v514_v28 = vpop.permute.xlu1 %513 }
 0xa3a   :  { %v516_v29 = vadd.f32 %v514_v28, %v506_v27 }
 0xa3c   :  { %1368 = vtanh.f32 %v516_v29 }
 0xa49   :  { %v1369_v30 = vpop.eup %1368 }
 0xa4a   :  { %519 = vrot.lane.b32.xlu0 %v1369_v30, %s1404_s5 }
 0xabc   :  { %v520_v31 = vpop.permute.xlu0 %519 }
 0xabd   :  { %v522_v32 = vmul.f32 %v1367_v22, %v520_v31 }
 0xabf   :  { %v939_v33 = vrot.slane %v522_v32, 2  ;;  %526 = vrot.lane.b32.xlu1 %v522_v32, %s1405_s6 }
 0xac1   :  { %v1528_v34 = vsel %vm952_vm6, %v951_v13, %v939_v33 }
 0xb31   :  { %v527_v35 = vpop.permute.xlu1 %526 }
 0xb32   :  { %1302 = vmatmul.mubr.msk.f32.vlgmr.msra.gmra.mxu0 %vm114_vm2, %v527_v35  ;;  %v833_v35 = vld [vmem:[#allocation2 + $0x7] ss:$8 sm:$0x3] }
 0xb33   :  { %1312 = vmatpush3.msra.mxu0 %v1446_v5  ;;  %1315 = vmatprep.mubr.msk.f32.mxu0 %vm1401_vm1, %v1400_v2 }
 0xb34   :  { %1313 = vmatprep.subr.mxu0 %v1400_v2 }
 0xb35   :  { %1314 = vmatpush3.msra.mxu0 %v1451_v6 }
 0xbf2   :  { %v596_v37 = vpop.f32.mrf.mxu0 }
 0xbf3   :  { %v600_v38 = vadd.f32 %v596_v37, %v524_v36 }
 0xbf4   :  { %v1303_v39 = vpop.f32.mrf.mxu0 }
 0xbf5   :  { %v1206_v40 = vmul.f32 -1.442695, %v600_v38 }
 0xbf7   :  { %1370 = vpow2.f32 %v1206_v40 }
 0xc04   :  { %v1371_v41 = vpop.eup %1370 }
 0xc05   :  { %v604_v42 = vadd.f32 1.0, %v1371_v41 }
 0xc07   :  { %1372 = vrcp.f32 %v604_v42 }
 0xc14   :  { %v1373_v43 = vpop.eup %1372 }
 0xc15   :  { %v607_v44 = vmul.f32 2.0, %v1373_v43  ;;  %v609_v48 = vmul.f32 %v1373_v43, %v516_v29 }
 0xc17   :  { %v1207_v45 = vadd.f32 -1.0, %v607_v44 }
 0xc19   :  { %611 = vrot.lane.b32.xlu0 %v1207_v45, %s1402_s30 }
 0xc8b   :  { %v612_v46 = vpop.permute.xlu0 %611 }
 0xc8c   :  { %v614_v47 = vmul.f32 %v1373_v43, %v612_v46 }
 0xc8e   :  { %616 = vrot.lane.b32.xlu1 %v614_v47, %s1403_s4 }
 0xd00   :  { %v617_v49 = vpop.permute.xlu1 %616 }
 0xd01   :  { %v619_v50 = vadd.f32 %v617_v49, %v609_v48 }
 0xd03   :  { %1374 = vtanh.f32 %v619_v50 }
 0xd10   :  { %v1375_v51 = vpop.eup %1374 }
 0xd11   :  { %622 = vrot.lane.b32.xlu0 %v1375_v51, %s1404_s5  ;;  %v958_v51 = vld [vmem:[%s1594_s2 + $0x39] sm:$0xff] }
 0xd12   :  { %1325 = vmatprep.subr.mxu0 %v958_v51 }
 0xd83   :  { %v623_v52 = vpop.permute.xlu0 %622 }
 0xd84   :  { %v1539_v53 = vmul.f32 %v1373_v43, %v623_v52  ;;  %v957_v52 = vld [vmem:[%s1594_s2 + $0x31] sm:$0xff] }
 0xd86   :  { %629 = vrot.lane.b32.xlu1 %v1539_v53, %s1405_s6 }
 0xdf8   :  { %v630_v54 = vpop.permute.xlu1 %629 }
 0xdf9   :  { %1309 = vmatmul.mubr.msk.f32.vlgmr.msra.gmra.mxu1 %vm114_vm2, %v630_v54  ;;  %v960_v54 = vlaneseq }
 0xdfa   :  { %1319 = vmatpush3.msra.mxu1 %v1446_v5  ;;  %1322 = vmatprep.mubr.msk.f32.mxu1 %vm1401_vm1, %v1400_v2 }
 0xdfb   :  { %1320 = vmatprep.subr.mxu1 %v1400_v2 }
 0xdfc   :  { %1321 = vmatpush3.msra.mxu1 %v1451_v6 }
 0xdfd   :  { %1332 = vmatprep.subr.mxu1 %v1400_v2 }
 0xeb9   :  { %v699_v56 = vpop.f32.mrf.mxu1 }
 0xeba   :  { %v703_v57 = vadd.f32 %v699_v56, %v627_v55  ;;  %v961_v55 = vshrl.u32 %v960_v54, 7 }
 0xebb   :  { %v1310_v58 = vpop.f32.mrf.mxu1 }
 0xebc   :  { %v1209_v59 = vmul.f32 -1.442695, %v703_v57  ;;  %v962_v56 = vsub.s32 0, %v961_v55 }
 0xebe   :  { %1376 = vpow2.f32 %v1209_v59 }
 0xecb   :  { %v1377_v60 = vpop.eup %1376 }
 0xecc   :  { %v707_v61 = vadd.f32 1.0, %v1377_v60 }
 0xece   :  { %1378 = vrcp.f32 %v707_v61 }
 0xedb   :  { %v1379_v62 = vpop.eup %1378 }
 0xedc   :  { %v710_v5 = vmul.f32 2.0, %v1379_v62  ;;  %v712_v6 = vmul.f32 %v1379_v62, %v619_v50 }
 0xede   :  { %v1210_v63 = vadd.f32 -1.0, %v710_v5 }
 0xee0   :  { %714 = vrot.lane.b32.xlu0 %v1210_v63, %s1402_s30 }
 0xf52   :  { %v715_v0 = vpop.permute.xlu0 %714 }
 0xf53   :  { %v717_v1 = vmul.f32 %v1379_v62, %v715_v0 }
 0xf55   :  { %719 = vrot.lane.b32.xlu1 %v717_v1, %s1403_s4 }
 0xfc7   :  { %v720_v3 = vpop.permute.xlu1 %719 }
 0xfc8   :  { %v722_v4 = vadd.f32 %v720_v3, %v712_v6 }
 0xfca   :  { %1380 = vtanh.f32 %v722_v4 }
 0xfd7   :  { %v1381_v7 = vpop.eup %1380 }
 0xfd8   :  { %725 = vrot.lane.b32.xlu0 %v1381_v7, %s1404_s5 }
0x104a   :  { %v726_v8 = vpop.permute.xlu0 %725 }
0x104b   :  { %v728_v9 = vmul.f32 %v1379_v62, %v726_v8 }
0x104d   :  { %732 = vrot.lane.b32.xlu1 %v728_v9, %s1405_s6  ;;  %v941_v27 = vrot.slane %v728_v9, 6 }
0x104f   :  { %v954_v31 = vsel %vm948_vm4, %v1539_v53, %v941_v27  ;;  %v959_v53 = vld [vmem:[%s1594_s2 + $0x41] sm:$0x1] }
0x1050   :  { %v963_v58 = vrot.slane %v959_v53, %v962_v56 }
0x10bf   :  { %v733_v10 = vpop.permute.xlu1 %732 }
0x10c0   :  { %1316 = vmatmul.mubr.msk.f32.vlgmr.msra.gmra.mxu0 %vm114_vm2, %v733_v10 }
0x10c1   :  { %1326 = vmatpush3.msra.mxu0 %v958_v51 }
0x10c2   :  { %1327 = vmatprep.subr.mxu0 %v957_v52 }
0x10c3   :  { %1328 = vmatpush3.msra.mxu0 %v957_v52 }
0x1180   :  { %v802_v12 = vpop.f32.mrf.mxu0 }
0x1181   :  { %v806_v13 = vadd.f32 %v802_v12, %v730_v11 }
0x1182   :  { %v1317_v14 = vpop.f32.mrf.mxu0 }
0x1183   :  { %v1212_v15 = vmul.f32 -1.442695, %v806_v13 }
0x1185   :  { %1382 = vpow2.f32 %v1212_v15 }
0x1192   :  { %v1383_v16 = vpop.eup %1382 }
0x1193   :  { %v810_v17 = vadd.f32 1.0, %v1383_v16 }
0x1195   :  { %1384 = vrcp.f32 %v810_v17 }
0x11a2   :  { %v1385_v18 = vpop.eup %1384 }
0x11a3   :  { %v813_v19 = vmul.f32 2.0, %v1385_v18  ;;  %v815_v23 = vmul.f32 %v1385_v18, %v722_v4 }
0x11a5   :  { %v1213_v20 = vadd.f32 -1.0, %v813_v19 }
0x11a7   :  { %817 = vrot.lane.b32.xlu0 %v1213_v20, %s1402_s30 }
0x1219   :  { %v818_v21 = vpop.permute.xlu0 %817 }
0x121a   :  { %v820_v22 = vmul.f32 %v1385_v18, %v818_v21 }
0x121c   :  { %822 = vrot.lane.b32.xlu1 %v820_v22, %s1403_s4 }
0x128e   :  { %v823_v24 = vpop.permute.xlu1 %822 }
0x128f   :  { %v825_v25 = vadd.f32 %v823_v24, %v815_v23 }
0x1291   :  { %1386 = vtanh.f32 %v825_v25 }
0x129e   :  { %v1387_v26 = vpop.eup %1386 }
0x129f   :  { %828 = vrot.lane.b32.xlu0 %v1387_v26, %s1404_s5 }
0x1311   :  { %v829_v28 = vpop.permute.xlu0 %828 }
0x1312   :  { %v831_v29 = vmul.f32 %v1385_v18, %v829_v28 }
0x1314   :  { %v943_v30 = vrot.slane %v831_v29, 4  ;;  %835 = vrot.lane.b32.xlu1 %v831_v29, %s1405_s6 }
0x1316   :  { %v955_v32 = vsel %vm950_vm5, %v954_v31, %v943_v30 }
0x1386   :  { %v836_v33 = vpop.permute.xlu1 %835 }
0x1387   :  { %1323 = vmatmul.mubr.msk.f32.vlgmr.msra.gmra.mxu1 %vm114_vm2, %v836_v33 }
0x1388   :  { %1336 = vmatprep.mubr.msk.f32.mxu1 %vm1401_vm1, %v1400_v2 }
0x1447   :  { %v905_v36 = vpop.f32.mrf.mxu1 }
0x1448   :  { %v909_v37 = vadd.f32 %v905_v36, %v833_v35 }
0x1449   :  { %v1324_v38 = vpop.f32.mrf.mxu1 }
0x144a   :  { %v1215_v39 = vmul.f32 -1.442695, %v909_v37 }
0x144c   :  { %1388 = vpow2.f32 %v1215_v39 }
0x1459   :  { %v1389_v40 = vpop.eup %1388 }
0x145a   :  { %v913_v41 = vadd.f32 1.0, %v1389_v40 }
0x145c   :  { %1390 = vrcp.f32 %v913_v41 }
0x1469   :  { %v1391_v42 = vpop.eup %1390 }
0x146a   :  { %v916_v43 = vmul.f32 2.0, %v1391_v42  ;;  %v918_v47 = vmul.f32 %v1391_v42, %v825_v25 }
0x146c   :  { %v1216_v44 = vadd.f32 -1.0, %v916_v43 }
0x146e   :  { %920 = vrot.lane.b32.xlu0 %v1216_v44, %s1402_s30 }
0x14e0   :  { %v921_v45 = vpop.permute.xlu0 %920 }
0x14e1   :  { %v923_v46 = vmul.f32 %v1391_v42, %v921_v45 }
0x14e3   :  { %925 = vrot.lane.b32.xlu1 %v923_v46, %s1403_s4 }
0x14e7   :  { %966 = vrot.lane.b32.xlu1 %v1528_v34, %s1405_s6 }
0x14eb   :  { %1079 = vrot.lane.b32.xlu1 %v959_v53, %s1406_s13 }
0x14ef   :  { %1099 = vrot.lane.b32.xlu1 %v958_v51, %s1406_s13 }
0x14f3   :  { %1103 = vrot.lane.b32.xlu1 %v963_v58, %s1405_s6 }
0x1555   :  { %v926_v48 = vpop.permute.xlu1 %925 }
0x1556   :  { %v928_v49 = vadd.f32 %v926_v48, %v918_v47 }
0x1558   :  { %1392 = vtanh.f32 %v928_v49 }
0x1559   :  { %v967_v50 = vpop.permute.xlu1 %966 }
0x155a   :  { %1329 = vmatprep.mubr.msk.f32.mxu0 %vm114_vm2, %v967_v50 }
0x155d   :  { %v1080_v63 = vpop.permute.xlu1 %1079 }
0x1561   :  { %v1100_v0 = vpop.permute.xlu1 %1099 }
0x1562   :  { %1333 = vmatpush3.msra.mxu1 %v1100_v0 }
0x1563   :  { %1334 = vmatprep.subr.mxu1 %v1400_v2 }
0x1565   :  { %v1393_v34 = vpop.eup %1392 }
0x1566   :  { %931 = vrot.lane.b32.xlu0 %v1393_v34, %s1404_s5 }
0x15d8   :  { %v932_v57 = vpop.permute.xlu0 %931 }
0x15d9   :  { %v934_v59 = vmul.f32 %v1391_v42, %v932_v57  ;;  %v1104_v42 = vpop.permute.xlu1 %1103 }
0x15db   :  { %v946_v60 = vrot.slane %v934_v59, 2 }
0x15dd   :  { %v956_v61 = vsel %vm952_vm6, %v955_v32, %v946_v60 }
0x15de   :  { %968 = vrot.lane.b32.xlu0 %v956_v61, %s1405_s6 }
0x15e2   :  { %1089 = vrot.lane.b32.xlu0 %v963_v58, %s1402_s30 }
0x15e6   :  { %1097 = vrot.lane.b32.xlu0 %v957_v52, %s1406_s13 }
0x1650   :  { %v969_v62 = vpop.permute.xlu0 %968 }
0x1651   :  { %1330 = vmatmul.mubr.msk.f32.vlgmr.msra.gmra.mxu0 %vm114_vm2, %v969_v62 }
0x1654   :  { %v1090_v5 = vpop.permute.xlu0 %1089 }
0x1658   :  { %v1098_v1 = vpop.permute.xlu0 %1097 }
0x1659   :  { %1335 = vmatpush3.msra.mxu1 %v1098_v1 }
0x1711   :  { %v1331_v6 = vpop.f32.mrf.mxu0 }
0x1712   :  { %v1046_v3 = vadd.f32 %v1331_v6, %v963_v58 }
0x1713   :  { %v1040_v4 = vpop.f32.mrf.mxu0 }
0x1714   :  { %v1050_v7 = vmax.f32 %v1046_v3, 0.0  ;;  %v1041_v8 = vadd.f32 %v1040_v4, %v963_v58 }
0x1716   :  { %v1061_v9 = vmul.f32 %v1050_v7, %v1050_v7  ;;  %v1049_v10 = vmax.f32 %v1041_v8, 0.0  ;;  %v1052_v12 = vsel %vm114_vm2, %v1050_v7, 0.0 }
0x1718   :  { %v1051_v11 = vsel %vm114_vm2, %v1049_v10, 0.0  ;;  %v1060_v13 = vmul.f32 %v1049_v10, %v1049_v10  ;;  %v1063_v16 = vsel %vm114_vm2, %v1061_v9, 0.0 }
0x1719   :  { %v1053_v14 = vadd.f32 %v1052_v12, %v1051_v11 }
0x171a   :  { %v1062_v15 = vsel %vm114_vm2, %v1060_v13, 0.0 }
0x171b   :  { %v1054_v17 = vrot.slane %v1053_v14, 4  ;;  %v1064_v2 = vadd.f32 %v1063_v16, %v1062_v15 }
0x171d   :  { %v1055_v18 = vadd.f32 %v1054_v17, %v1053_v14  ;;  %v1065_v19 = vrot.slane %v1064_v2, 4 }
0x171f   :  { %v1056_v20 = vrot.slane %v1055_v18, 2  ;;  %v1066_v21 = vadd.f32 %v1065_v19, %v1064_v2 }
0x1721   :  { %v1057_v22 = vadd.f32 %v1056_v20, %v1055_v18  ;;  %v1067_v23 = vrot.slane %v1066_v21, 2 }
0x1723   :  { %v1058_v24 = vrot.slane %v1057_v22, 1  ;;  %v1068_v25 = vadd.f32 %v1067_v23, %v1066_v21 }
0x1725   :  { %v1059_v26 = vadd.f32 %v1058_v24, %v1057_v22  ;;  %v1069_v27 = vrot.slane %v1068_v25, 1 }
0x1727   :  { %v1070_v28 = vadd.f32 %v1069_v27, %v1068_v25  ;;  %v1071_v29 = vmul.f32 0.0625, %v1059_v26 }
0x1729   :  { %v1072_v30 = vmul.f32 0.0625, %v1070_v28  ;;  %v1073_v31 = vmul.f32 %v1071_v29, %v1071_v29  ;;  %v1075_v38 = vsub.f32 %v1050_v7, %v1071_v29 }
0x172b   :  { %v1074_v32 = vsub.f32 %v1072_v30, %v1073_v31 }
0x172d   :  { %v1076_v33 = vadd.f32 1e-05, %v1074_v32 }
0x172f   :  { %1394 = vrsqrt.f32 %v1076_v33 }
0x173c   :  { %v1395_v35 = vpop.eup %1394 }
0x173d   :  { %v1082_v36 = vmul.f32 %v1395_v35, %v1080_v63 }
0x173f   :  { %v1086_v37 = vrot.slane %v1082_v36, %v962_v56 }
0x1741   :  { %v1087_v39 = vmul.f32 %v1086_v37, %v1075_v38 }
0x1743   :  { %v1092_v40 = vadd.f32 %v1090_v5, %v1087_v39 }
0x1745   :  { %v1094_v41 = vrot.slane %v1092_v40, 6 }
0x1747   :  { %1337 = vmatmul.mubr.msk.f32.vlgmr.msra.gmra.mxu1 %vm114_vm2, %v1094_v41 }
0x1807   :  { %v1174_v43 = vpop.f32.mrf.mxu1 }
0x1808   :  { %v1175_v44 = vadd.f32 %v1174_v43, %v1104_v42 }
0x1809   :  { %v1338_v45 = vpop.f32.mrf.mxu1 }
0x180a   :  { %v1220_v46 = vmul.f32 -1.442695, %v1175_v44 }
0x180c   :  { %1396 = vpow2.f32 %v1220_v46 }
0x1819   :  { %v1397_v47 = vpop.eup %1396 }
0x181a   :  { %v1181_v48 = vadd.f32 1.0, %v1397_v47 }
0x181c   :  { %1398 = vrcp.f32 %v1181_v48 }
0x1829   :  { %v1399_v49 = vpop.eup %1398 }
0x182a   :  { %1185 = vst.msk [vmem:[%s1597_s3] sm:$0x3] %vm1184_vm7, %v1399_v49 }

</bundles_post_ra>
